<compile_context>
chip_gen: v6e
topology: v6e:2x2x1
jax: 0.10.0
libtpu: 0.0.40
codegen_flags: <defaults>
</compile_context>

<pallas_src>
import jax
import jax.numpy as jnp
from jax import lax
from jax.experimental import pallas as pl
from jax.experimental.pallas import tpu as pltpu


def _round_up(a: int, m: int) -> int:
    return (a + m - 1) // m * m


def _split_dim(size: int, tile_max: int, align: int):
    """Split `size` into n tiles of equal width `tile` (multiple of `align`,
    <= tile_max), minimizing padding waste. Returns (tile, padded_size)."""
    tile_max = max(align, tile_max // align * align)
    padded_min = _round_up(size, align)
    n = pl.cdiv(padded_min, tile_max)
    tile = _round_up(pl.cdiv(padded_min, n), align)
    return tile, n * tile


# --------------------------------------------------------------------------
# Kernels
# --------------------------------------------------------------------------

def _fused_kernel(x_ref, w_ref, b_ref, o_ref, acc_zp):
    """Single weight stream; LRP z+ transform clamp(min=0) fused in-kernel."""
    k = pl.program_id(2)

    @pl.when(k == 0)
    def _init():
        o_ref[...] = jnp.zeros_like(o_ref)          # o_ref is the z accumulator
        acc_zp[...] = jnp.zeros_like(acc_zp)

    x = x_ref[...]                                   # (tm, tk)
    w = w_ref[...]                                   # (tk, tn), K-major
    wp = jnp.maximum(w, 0)                           # VPU filler under the MXU slot
    o_ref[...] += jnp.dot(x, w, preferred_element_type=jnp.float32)
    acc_zp[...] += jnp.dot(x, wp, preferred_element_type=jnp.float32)

    @pl.when(k == pl.num_programs(2) - 1)
    def _finalize():
        b = b_ref[...]                               # (1, tn), f32
        z = o_ref[...] + b
        zp = acc_zp[...] + jnp.maximum(b, 0.0)
        # stabilize: == zp + ((zp == 0) + sign(zp)) * 1e-6
        zp = jnp.where(zp >= 0.0, zp + 1e-6, zp - 1e-6)
        ratio = lax.stop_gradient(z / zp)            # TODO(synk): needs custom_vjp for LRP grad
        o_ref[...] = (zp * ratio).astype(o_ref.dtype)


def _general_kernel(x_ref, w_ref, wp_ref, b_ref, bp_ref, o_ref, acc_zp):
    """Fallback: arbitrary (pre-transformed) modified weights/bias streamed in."""
    k = pl.program_id(2)

    @pl.when(k == 0)
    def _init():
        o_ref[...] = jnp.zeros_like(o_ref)
        acc_zp[...] = jnp.zeros_like(acc_zp)

    x = x_ref[...]
    o_ref[...] += jnp.dot(x, w_ref[...], preferred_element_type=jnp.float32)
    acc_zp[...] += jnp.dot(x, wp_ref[...], preferred_element_type=jnp.float32)

    @pl.when(k == pl.num_programs(2) - 1)
    def _finalize():
        z = o_ref[...] + b_ref[...]
        zp = acc_zp[...] + bp_ref[...]
        zp = jnp.where(zp >= 0.0, zp + 1e-6, zp - 1e-6)
        ratio = lax.stop_gradient(z / zp)
        o_ref[...] = (zp * ratio).astype(o_ref.dtype)


# --------------------------------------------------------------------------
# Parameter preparation (once per layer — NOT per forward call)
# --------------------------------------------------------------------------

def prepare_modified_linear(w, b, w_mod=None, b_mod=None, *, batch_hint=None,
                            tm=256, tn=512, tk=2048,
                            compute_dtype=jnp.float32):
    """Pad OUT/IN to the tile grid and transpose weights to K-major (IN, OUT).

    w_mod/b_mod None  -> LRP z+ transform clamp(min=0) is fused in-kernel
                         (single weight stream; recommended).
    w_mod/b_mod given -> generic pre-transformed parameters (two streams).
    """
    w = jnp.asarray(w)
    b = jnp.asarray(b)
    OUT, IN = w.shape

    tn_t, OUTp = _split_dim(OUT, tn, 128)
    tk_t, INp = _split_dim(IN, tk, 128)
    # Megacore (v7x): if the problem fits a single (row, col) tile pair, both
    # 'parallel' grid axes collapse to 1 and one TensorCore idles; split OUT.
    single_row = batch_hint is None or _round_up(int(batch_hint), 8) <= tm
    if single_row and OUTp == tn_t and tn_t > 128:
        tn_t, OUTp = _split_dim(OUT, max(128, (tn_t // 2) // 128 * 128), 128)

    def prep_w(m):
        m = jnp.asarray(m, compute_dtype)
        if m.shape != (OUT, IN):
            raise ValueError("weight shape mismatch")
        if (OUTp, INp) != (OUT, IN):
            m = jnp.pad(m, ((0, OUTp - OUT), (0, INp - IN)))
        return m.T                                   # K-major (INp, OUTp)

    def prep_b(v):
        v = jnp.asarray(v, jnp.float32)              # bias stays f32 (added to f32 acc)
        if OUTp != OUT:
            v = jnp.pad(v, (0, OUTp - OUT))
        return v.reshape(1, OUTp)

    fused = w_mod is None
    if not fused and b_mod is None:
        raise ValueError("pass b_mod together with w_mod (or neither)")

    return {
        "w_t": prep_w(w),
        "b2": prep_b(b),
        "wp_t": None if fused else prep_w(w_mod),
        "bp2": None if fused else prep_b(b_mod),
        "fused": fused,
        "out_dim": OUT,
        "in_dim": IN,
        "tn": tn_t,
        "tk": tk_t,
        "tm_max": tm,
        "compute_dtype": compute_dtype,
    }


# --------------------------------------------------------------------------
# Forward
# --------------------------------------------------------------------------

def modified_linear(x, params):
    """ModifiedLinear forward using prepared params. Returns float32 (B, OUT)."""
    compute_dtype = params["compute_dtype"]
    x = jnp.asarray(x, compute_dtype)
    B, IN = x.shape
    if IN != params["in_dim"]:
        raise ValueError("input feature dim mismatch")

    tn, tk = params["tn"], params["tk"]
    INp, OUTp = params["w_t"].shape
    tm, Bp = _split_dim(B, params["tm_max"], 8)
    if (Bp, INp) != (B, IN):
        x = jnp.pad(x, ((0, Bp - B), (0, INp - IN)))   # zero-pad: padded K adds 0 to z/zp

    fused = params["fused"]
    grid = (Bp // tm, OUTp // tn, INp // tk)

    in_specs = [pl.BlockSpec((tm, tk), lambda i, j, k: (i, k)),   # x
                pl.BlockSpec((tk, tn), lambda i, j, k: (k, j))]   # W (K-major)
    operands = [x, params["w_t"]]
    if not fused:
        in_specs.append(pl.BlockSpec((tk, tn), lambda i, j, k: (k, j)))   # W_mod
        operands.append(params["wp_t"])
    in_specs.append(pl.BlockSpec((1, tn), lambda i, j, k: (0, j)))        # b
    operands.append(params["b2"])
    if not fused:
        in_specs.append(pl.BlockSpec((1, tn), lambda i, j, k: (0, j)))    # b_mod
        operands.append(params["bp2"])

    isz = jnp.dtype(compute_dtype).itemsize
    n_w = 1 if fused else 2
    footprint = (2 * (tm * tk + n_w * tk * tn) * isz   # double-buffered x + weights
                 + 2 * (2 - int(fused)) * tn * 4       # biases (tiny)
                 + 2 * tm * tn * 4                     # double-buffered output (z acc)
                 + tm * tn * 4)                        # acc_zp scratch
    vmem_limit = min(96 * 1024 * 1024, max(32 * 1024 * 1024, int(footprint * 1.4)))

    out = pl.pallas_call(
        _fused_kernel if fused else _general_kernel,
        out_shape=jax.ShapeDtypeStruct((Bp, OUTp), jnp.float32),
        grid_spec=pltpu.PrefetchScalarGridSpec(
            num_scalar_prefetch=0,
            grid=grid,
            in_specs=in_specs,
            out_specs=pl.BlockSpec((tm, tn), lambda i, j, k: (i, j)),
            scratch_shapes=[pltpu.VMEM((tm, tn), jnp.float32)],   # acc_zp
        ),
        compiler_params=pltpu.CompilerParams(
            dimension_semantics=("parallel", "parallel", "arbitrary"),
            vmem_limit_bytes=vmem_limit,
        ),
        cost_estimate=pl.CostEstimate(
            flops=2 * 2 * Bp * INp * OUTp,
            transcendentals=0,
            bytes_accessed=(Bp * INp + n_w * OUTp * INp) * isz
                           + (2 - int(fused)) * OUTp * 4 + Bp * OUTp * 4,
        ),
    )(*operands)

    return out[:B, :params["out_dim"]]


# --------------------------------------------------------------------------
# Reference + self-test
# --------------------------------------------------------------------------

def _reference(x, w, b, w_mod, b_mod):
    z = x @ w.T + b
    zp = x @ w_mod.T + b_mod
    zp = zp + ((zp == 0.0).astype(zp.dtype) + jnp.sign(zp)) * 1e-6
    return zp * (z / zp)


def _make_linear(key, IN, OUT):
    kw, kb = jax.random.split(key)
    bound = 1.0 / (IN ** 0.5)
    w = jax.random.uniform(kw, (OUT, IN), jnp.float32, -bound, bound)
    b = jax.random.uniform(kb, (OUT,), jnp.float32, -bound, bound)
    return w, b


if __name__ == "__main__":
    key = jax.random.PRNGKey(0)
    k1, k2, k3, k4 = jax.random.split(key, 4)

    # Case 1: small shape matching the module's forward; fused z+ rule.
    B, IN, OUT = 8, 32, 16
    x = jax.random.normal(k1, (B, IN), jnp.float32)
    w, b = _make_linear(k2, IN, OUT)
    params = prepare_modified_linear(w, b, batch_hint=B)
    out = jax.block_until_ready(modified_linear(x, params))
    ref = _reference(x, w, b, jnp.clip(w, 0.0, None), jnp.clip(b, 0.0, None))
    assert out.shape == (B, OUT) and out.dtype == jnp.float32
    assert jnp.allclose(out, ref, atol=1e-4, rtol=1e-4)

    # Case 2: multi-tile grid (j, k > 1), OUT padding, megacore OUT split.
    B2, IN2, OUT2 = 96, 2304, 384
    x2 = jax.random.normal(k3, (B2, IN2), jnp.float32)
    w2, bias2 = _make_linear(k4, IN2, OUT2)
    params2 = prepare_modified_linear(w2, bias2, batch_hint=B2)
    out2 = jax.block_until_ready(modified_linear(x2, params2))
    ref2 = _reference(x2, w2, bias2, jnp.clip(w2, 0.0, None), jnp.clip(bias2, 0.0, None))
    assert out2.shape == (B2, OUT2)
    assert jnp.allclose(out2, ref2, atol=2e-3, rtol=2e-3)

    # Case 3: general (non-fusable) transform path, e.g. LRP gamma rule.
    gamma = 0.25
    w3m = w2 + gamma * jnp.clip(w2, 0.0, None)
    b3m = bias2 + gamma * jnp.clip(bias2, 0.0, None)
    params3 = prepare_modified_linear(w2, bias2, w_mod=w3m, b_mod=b3m, batch_hint=B2)
    out3 = jax.block_until_ready(modified_linear(x2, params3))
    ref3 = _reference(x2, w2, bias2, w3m, b3m)
    assert jnp.allclose(out3, ref3, atol=2e-3, rtol=2e-3)

    # Case 4: bf16 compute path (f32 accumulation) — forward == z analytically,
    # so error vs the f32 reference is just bf16 input rounding.
    params4 = prepare_modified_linear(w2, bias2, batch_hint=B2,
                                      compute_dtype=jnp.bfloat16)
    out4 = jax.block_until_ready(modified_linear(x2, params4))
    assert jnp.allclose(out4, ref2, atol=3e-2, rtol=3e-2)

    print("KERNEL_OK")
</pallas_src>

<mosaic_0001>
module attributes {stable_mosaic.version = 11 : i64} {
  func.func @_fused_kernel(%arg0: i32, %arg1: i32, %arg2: i32, %arg3: memref<8x128xf32, #tpu.memory_space<vmem>>, %arg4: memref<128x128xf32, #tpu.memory_space<vmem>>, %arg5: memref<1x128xf32, #tpu.memory_space<vmem>>, %arg6: memref<8x128xf32, #tpu.memory_space<vmem>>, %arg7: memref<8x128xf32, #tpu.memory_space<vmem>>) attributes {dimension_semantics = [#tpu.dimension_semantics<parallel>, #tpu.dimension_semantics<parallel>, #tpu.dimension_semantics<arbitrary>], iteration_bounds = array<i64: 1, 1, 1>, scalar_prefetch = 0 : i64, scratch_operands = 1 : i64, tpu.core_type = #tpu.core_type<tc>, window_params = [{transform_indices = @transform_0, window_bounds = array<i64: 8, 128>}, {transform_indices = @transform_1, window_bounds = array<i64: 128, 128>}, {transform_indices = @transform_2, window_bounds = array<i64: 1, 128>}, {transform_indices = @transform_3, window_bounds = array<i64: 8, 128>}]} {
    %c0_i32 = arith.constant 0 : i32
    %0 = arith.cmpi eq, %arg2, %c0_i32 : i32
    %1 = arith.extui %0 : i1 to i32
    %c0_i32_0 = arith.constant 0 : i32
    %2 = arith.cmpi ne, %1, %c0_i32_0 : i32
    scf.if %2 {
      %cst_16 = arith.constant 0.000000e+00 : f32
      %18 = vector.broadcast %cst_16 : f32 to vector<8x128xf32>
      %c0_17 = arith.constant 0 : index
      %c0_18 = arith.constant 0 : index
      %19 = vector.load %arg6[%c0_17, %c0_18] : memref<8x128xf32, #tpu.memory_space<vmem>>, vector<8x128xf32>
      tpu.vector_store %arg6[%c0_17, %c0_18], %18 {strides = array<i32>} : memref<8x128xf32, #tpu.memory_space<vmem>>, vector<8x128xf32>,
      %cst_19 = arith.constant 0.000000e+00 : f32
      %20 = vector.broadcast %cst_19 : f32 to vector<8x128xf32>
      %c0_20 = arith.constant 0 : index
      %c0_21 = arith.constant 0 : index
      %21 = vector.load %arg7[%c0_20, %c0_21] : memref<8x128xf32, #tpu.memory_space<vmem>>, vector<8x128xf32>
      tpu.vector_store %arg7[%c0_20, %c0_21], %20 {strides = array<i32>} : memref<8x128xf32, #tpu.memory_space<vmem>>, vector<8x128xf32>,
    } else {
    }
    %c0 = arith.constant 0 : index
    %c0_1 = arith.constant 0 : index
    %3 = vector.load %arg3[%c0, %c0_1] : memref<8x128xf32, #tpu.memory_space<vmem>>, vector<8x128xf32>
    %c0_2 = arith.constant 0 : index
    %c0_3 = arith.constant 0 : index
    %4 = vector.load %arg4[%c0_2, %c0_3] : memref<128x128xf32, #tpu.memory_space<vmem>>, vector<128x128xf32>
    %cst = arith.constant 0.000000e+00 : f32
    %5 = vector.broadcast %cst : f32 to vector<128x128xf32>
    %6 = arith.maximumf %4, %5 : vector<128x128xf32>
    %c0_4 = arith.constant 0 : index
    %c0_5 = arith.constant 0 : index
    %7 = vector.load %arg6[%c0_4, %c0_5] : memref<8x128xf32, #tpu.memory_space<vmem>>, vector<8x128xf32>
    %cst_6 = arith.constant dense<0.000000e+00> : vector<8x128xf32>
    %8 = tpu.matmul %3, %4, %cst_6 {dimension_numbers = #tpu.dot_dimension_numbers<[1], [0], [0], [1], [0, 0, 1, 1], [], []>} : vector<8x128xf32>, vector<128x128xf32>, vector<8x128xf32> -> vector<8x128xf32>
    %9 = arith.addf %7, %8 : vector<8x128xf32>
    %c0_7 = arith.constant 0 : index
    %c0_8 = arith.constant 0 : index
    %10 = vector.load %arg6[%c0_7, %c0_8] : memref<8x128xf32, #tpu.memory_space<vmem>>, vector<8x128xf32>
    tpu.vector_store %arg6[%c0_7, %c0_8], %9 {strides = array<i32>} : memref<8x128xf32, #tpu.memory_space<vmem>>, vector<8x128xf32>,
    %c0_9 = arith.constant 0 : index
    %c0_10 = arith.constant 0 : index
    %11 = vector.load %arg7[%c0_9, %c0_10] : memref<8x128xf32, #tpu.memory_space<vmem>>, vector<8x128xf32>
    %cst_11 = arith.constant dense<0.000000e+00> : vector<8x128xf32>
    %12 = tpu.matmul %3, %6, %cst_11 {dimension_numbers = #tpu.dot_dimension_numbers<[1], [0], [0], [1], [0, 0, 1, 1], [], []>} : vector<8x128xf32>, vector<128x128xf32>, vector<8x128xf32> -> vector<8x128xf32>
    %13 = arith.addf %11, %12 : vector<8x128xf32>
    %c0_12 = arith.constant 0 : index
    %c0_13 = arith.constant 0 : index
    %14 = vector.load %arg7[%c0_12, %c0_13] : memref<8x128xf32, #tpu.memory_space<vmem>>, vector<8x128xf32>
    tpu.vector_store %arg7[%c0_12, %c0_13], %13 {strides = array<i32>} : memref<8x128xf32, #tpu.memory_space<vmem>>, vector<8x128xf32>,
    %c0_i32_14 = arith.constant 0 : i32
    %15 = arith.cmpi eq, %arg2, %c0_i32_14 : i32
    %16 = arith.extui %15 : i1 to i32
    %c0_i32_15 = arith.constant 0 : i32
    %17 = arith.cmpi ne, %16, %c0_i32_15 : i32
    scf.if %17 {
      %c0_16 = arith.constant 0 : index
      %c0_17 = arith.constant 0 : index
      %18 = vector.load %arg5[%c0_16, %c0_17] : memref<1x128xf32, #tpu.memory_space<vmem>>, vector<1x128xf32>
      %c0_18 = arith.constant 0 : index
      %c0_19 = arith.constant 0 : index
      %19 = vector.load %arg6[%c0_18, %c0_19] : memref<8x128xf32, #tpu.memory_space<vmem>>, vector<8x128xf32>
      %20 = vector.broadcast %18 : vector<1x128xf32> to vector<8x128xf32>
      %21 = arith.addf %19, %20 : vector<8x128xf32>
      %c0_20 = arith.constant 0 : index
      %c0_21 = arith.constant 0 : index
      %22 = vector.load %arg7[%c0_20, %c0_21] : memref<8x128xf32, #tpu.memory_space<vmem>>, vector<8x128xf32>
      %cst_22 = arith.constant 0.000000e+00 : f32
      %23 = vector.broadcast %cst_22 : f32 to vector<1x128xf32>
      %24 = arith.maximumf %18, %23 : vector<1x128xf32>
      %25 = vector.broadcast %24 : vector<1x128xf32> to vector<8x128xf32>
      %26 = arith.addf %22, %25 : vector<8x128xf32>
      %cst_23 = arith.constant 0.000000e+00 : f32
      %27 = vector.broadcast %cst_23 : f32 to vector<8x128xf32>
      %28 = arith.cmpf oge, %26, %27 : vector<8x128xf32>
      %cst_24 = arith.constant 9.99999997E-7 : f32
      %29 = vector.broadcast %cst_24 : f32 to vector<8x128xf32>
      %30 = arith.addf %26, %29 : vector<8x128xf32>
      %cst_25 = arith.constant 9.99999997E-7 : f32
      %31 = vector.broadcast %cst_25 : f32 to vector<8x128xf32>
      %32 = arith.subf %26, %31 : vector<8x128xf32>
      %33 = arith.select %28, %30, %32 : vector<8x128xi1>, vector<8x128xf32>
      %34 = arith.divf %21, %33 : vector<8x128xf32>
      %35 = arith.mulf %33, %34 : vector<8x128xf32>
      %c0_26 = arith.constant 0 : index
      %c0_27 = arith.constant 0 : index
      %36 = vector.load %arg6[%c0_26, %c0_27] : memref<8x128xf32, #tpu.memory_space<vmem>>, vector<8x128xf32>
      tpu.vector_store %arg6[%c0_26, %c0_27], %35 {strides = array<i32>} : memref<8x128xf32, #tpu.memory_space<vmem>>, vector<8x128xf32>,
    } else {
    }
    return
  }
  func.func @transform_0(%arg0: i32, %arg1: i32, %arg2: i32) -> (i32, i32) {
    %c0_i32 = arith.constant 0 : i32
    return %arg0, %arg2 : i32, i32
  }
  func.func @transform_1(%arg0: i32, %arg1: i32, %arg2: i32) -> (i32, i32) {
    %c0_i32 = arith.constant 0 : i32
    return %arg2, %arg1 : i32, i32
  }
  func.func @transform_2(%arg0: i32, %arg1: i32, %arg2: i32) -> (i32, i32) {
    %c0_i32 = arith.constant 0 : i32
    %c0_i32_0 = arith.constant 0 : i32
    return %c0_i32, %arg1 : i32, i32
  }
  func.func @transform_3(%arg0: i32, %arg1: i32, %arg2: i32) -> (i32, i32) {
    %c0_i32 = arith.constant 0 : i32
    return %arg0, %arg1 : i32, i32
  }
}

</mosaic_0001>

<bundles_post_ra>
// kernel: tpu_custom_call.1
= control target key start
LH: loop header
LB: loop body
LE: loop exit
PB: predicated region body
PF: predicated region fallthrough
CT: control target
= control target key end

     0   :  { %8 = vsyncpa [#allocation4], 0  ;;  %s524_s0 = inlined_call_operand.hbm [shape: f32[8,128], index: 0, kind: input, shape index: {}]   ;;  %s525_s1 = inlined_call_operand.hbm [shape: f32[128,128], index: 1, kind: input, shape index: {}]   ;;  %s526_s2 = inlined_call_operand.vmem [shape: f32[1,128], index: 2, kind: input, shape index: {}]   ;;  %s527_s3 = inlined_call_operand.hbm [shape: f32[8,128], index: 3, kind: output, shape index: {}]  }
   0x1   :  { %9 = vsyncpa [#allocation7], 0 }
   0x2   :  { %10 = vsyncpa [#allocation5], 0  ;;  %s451_s12 = smov [#allocation3]   ;;  %s452_s14 = smov [#allocation6]  }
   0x3   :  { %s17_s13 = sshll.u32 %s451_s12, 4  ;;  %s26_s15 = sshll.u32 %s452_s14, 4  ;;  %s18_s13 = int_to_ptr.vmem [resolvable:$true] %s17_s13  ;;  %s27_s15 = int_to_ptr.vmem [resolvable:$true] %s26_s15 }
   0x4   :  { %s393_s16 = scalar_lea.vmem %s18_s13, 128  ;;  %p398_p1 = scmp.lt.s32.totalorder %s18_s13, %s18_s13 }
   0x5   :  { %p394_p0 = scmp.ne.s32.totalorder %s18_s13, %s393_s16  ;;  %p399_p2 = scmp.lt.s32.totalorder %s393_s16, %s393_s16 }
   0x7   :  { %p400_p3 = por %p399_p2, %p398_p1 }
   0x9   :  { %p401_p4 = pnand %p400_p3, %p394_p0 }
   0xb   :  { %404 = shalt.err (!%p401_p4)
}
   0xc   :  { %20 = dma.hbm_to_vmem [thread:$0]  %s524_s0, 128, %s18_s13, [#allocation4]  }
   0xd   :  { %s413_s19 = scalar_lea.vmem %s27_s15, 2048  ;;  %p418_p6 = scmp.lt.s32.totalorder %s27_s15, %s27_s15 }
   0xe   :  { %p414_p5 = scmp.ne.s32.totalorder %s27_s15, %s413_s19  ;;  %p419_p7 = scmp.lt.s32.totalorder %s413_s19, %s413_s19 }
  0x10   :  { %p420_p8 = por %p419_p7, %p418_p6 }
  0x12   :  { %p421_p9 = pnand %p420_p8, %p414_p5 }
  0x14   :  { %424 = shalt.err (!%p421_p9)
}
  0x15   :  { %s453_s20 = smov 128   ;;  %s454_s21 = smov 8  }
  0x16   :  { %32 = dma.hbm_to_vmem [thread:$0]  %s525_s1, 2048, %s27_s15, [#allocation7], %s453_s20, %s453_s20, %s454_s21  }
  0x17   :  { %445 = dma.done.wait [#allocation4], 128  }
  0x18   :  { %446 = vsyncadd [#allocation4], 4294967168 }
  0x19   :  { %447 = dma.done.wait [#allocation7], 2048  }
  0x1a   :  { %448 = vsyncadd [#allocation7], 4294965248  ;;  %v455_v0 = vmov 0.0   ;;  %vm456_vm0 = vmmov 0   ;;  %v63_v1 = vld [vmem:[#allocation6 + $0x78] sm:$0xff]  ;;  %v62_v2 = vld [vmem:[#allocation6 + $0x70] sm:$0xff]  ;;  %v232_v34 = vlaneseq }
  0x1b   :  { %341 = vmatprep.subr.mxu1 %v455_v0  ;;  %306 = vmatprep.subr.mxu0 %v455_v0  ;;  %v61_v3 = vld [vmem:[#allocation6 + $0x68] sm:$0xff]  ;;  %v79_v4 = vmax.f32 %v63_v1, 0.0  ;;  %v78_v5 = vmax.f32 %v62_v2, 0.0  ;;  %v60_v6 = vld [vmem:[#allocation6 + $0x60] sm:$0xff]  ;;  %v59_v8 = vld [vmem:[#allocation6 + $0x58] sm:$0xff]  ;;  %s457_s24 = smov [#allocation8]  }
  0x1c   :  { %373 = vmatprep.mubr.msk.f32.mxu1 %vm456_vm0, %v455_v0  ;;  %338 = vmatprep.mubr.msk.f32.mxu0 %vm456_vm0, %v455_v0  ;;  %v77_v7 = vmax.f32 %v61_v3, 0.0  ;;  %v76_v9 = vmax.f32 %v60_v6, 0.0  ;;  %v58_v10 = vld [vmem:[#allocation6 + $0x50] sm:$0xff]  ;;  %v75_v11 = vmax.f32 %v59_v8, 0.0  ;;  %v57_v12 = vld [vmem:[#allocation6 + $0x48] sm:$0xff]  ;;  %v56_v14 = vld [vmem:[#allocation6 + $0x40] sm:$0xff] }
  0x1d   :  { %307 = vmatpush3.msra.mxu0 %v63_v1  ;;  %342 = vmatpush3.msra.mxu1 %v79_v4  ;;  %v74_v13 = vmax.f32 %v58_v10, 0.0  ;;  %v73_v15 = vmax.f32 %v57_v12, 0.0  ;;  %v55_v16 = vld [vmem:[#allocation6 + $0x38] sm:$0xff]  ;;  %v72_v17 = vmax.f32 %v56_v14, 0.0  ;;  %v54_v18 = vld [vmem:[#allocation6 + $0x30] sm:$0xff]  ;;  %v53_v20 = vld [vmem:[#allocation6 + $0x28] sm:$0xff] }
  0x1e   :  { %308 = vmatprep.subr.mxu0 %v455_v0  ;;  %343 = vmatprep.subr.mxu1 %v455_v0  ;;  %v71_v19 = vmax.f32 %v55_v16, 0.0  ;;  %v70_v21 = vmax.f32 %v54_v18, 0.0  ;;  %v52_v22 = vld [vmem:[#allocation6 + $0x20] sm:$0xff]  ;;  %v69_v23 = vmax.f32 %v53_v20, 0.0  ;;  %v51_v24 = vld [vmem:[#allocation6 + $0x18] sm:$0xff]  ;;  %v50_v26 = vld [vmem:[#allocation6 + $0x10] sm:$0xff] }
  0x1f   :  { %309 = vmatpush3.msra.mxu0 %v62_v2  ;;  %344 = vmatpush3.msra.mxu1 %v78_v5  ;;  %v68_v25 = vmax.f32 %v52_v22, 0.0  ;;  %v67_v27 = vmax.f32 %v51_v24, 0.0  ;;  %v49_v28 = vld [vmem:[#allocation6 + $0x8] sm:$0xff]  ;;  %v66_v29 = vmax.f32 %v50_v26, 0.0  ;;  %v48_v30 = vld [vmem:[#allocation6] sm:$0xff]  ;;  %v47_v33 = vld [vmem:[#allocation3] sm:$0xff] }
  0x20   :  { %310 = vmatprep.subr.mxu0 %v455_v0  ;;  %345 = vmatprep.subr.mxu1 %v455_v0  ;;  %v65_v31 = vmax.f32 %v49_v28, 0.0  ;;  %v64_v32 = vmax.f32 %v48_v30, 0.0  ;;  %v233_v35 = vshrl.u32 %v232_v34, 7  ;;  %v229_v36 = vld [vmem:[%s526_s2] sm:$0x1]  ;;  %s261_s25 = sshll.u32 %s457_s24, 4  ;;  %s262_s25 = int_to_ptr.vmem [resolvable:$true] %s261_s25 }
  0x21   :  { %311 = vmatpush3.msra.mxu0 %v61_v3  ;;  %346 = vmatpush3.msra.mxu1 %v77_v7  ;;  %v239_v38 = vmax.f32 %v229_v36, 0.0  ;;  %s425_s2 = scalar_lea.vmem %s262_s25, 128  ;;  %p430_p11 = scmp.lt.s32.totalorder %s262_s25, %s262_s25 }
  0x22   :  { %312 = vmatprep.subr.mxu0 %v455_v0  ;;  %347 = vmatprep.subr.mxu1 %v455_v0  ;;  %v234_v37 = vsub.s32 0, %v233_v35  ;;  %p426_p10 = scmp.ne.s32.totalorder %s262_s25, %s425_s2  ;;  %p431_p12 = scmp.lt.s32.totalorder %s425_s2, %s425_s2 }
  0x23   :  { %313 = vmatpush3.msra.mxu0 %v60_v6  ;;  %348 = vmatpush3.msra.mxu1 %v76_v9 }
  0x24   :  { %314 = vmatprep.subr.mxu0 %v455_v0  ;;  %349 = vmatprep.subr.mxu1 %v455_v0  ;;  %v244_v39 = vrot.slane %v239_v38, %v234_v37  ;;  %v235_v48 = vrot.slane %v229_v36, %v234_v37  ;;  %p432_p13 = por %p431_p12, %p430_p11 }
  0x25   :  { %315 = vmatpush3.msra.mxu0 %v59_v8  ;;  %350 = vmatpush3.msra.mxu1 %v75_v11 }
  0x26   :  { %316 = vmatprep.subr.mxu0 %v455_v0  ;;  %351 = vmatprep.subr.mxu1 %v455_v0  ;;  %p433_p0 = pnand %p432_p13, %p426_p10 }
  0x27   :  { %317 = vmatpush3.msra.mxu0 %v58_v10  ;;  %352 = vmatpush3.msra.mxu1 %v74_v13 }
  0x28   :  { %318 = vmatprep.subr.mxu0 %v455_v0  ;;  %353 = vmatprep.subr.mxu1 %v455_v0 }
  0x29   :  { %319 = vmatpush3.msra.mxu0 %v57_v12  ;;  %354 = vmatpush3.msra.mxu1 %v73_v15 }
  0x2a   :  { %320 = vmatprep.subr.mxu0 %v455_v0  ;;  %355 = vmatprep.subr.mxu1 %v455_v0 }
  0x2b   :  { %321 = vmatpush3.msra.mxu0 %v56_v14  ;;  %356 = vmatpush3.msra.mxu1 %v72_v17 }
  0x2c   :  { %322 = vmatprep.subr.mxu0 %v455_v0  ;;  %357 = vmatprep.subr.mxu1 %v455_v0 }
  0x2d   :  { %323 = vmatpush3.msra.mxu0 %v55_v16  ;;  %358 = vmatpush3.msra.mxu1 %v71_v19 }
  0x2e   :  { %324 = vmatprep.subr.mxu0 %v455_v0  ;;  %359 = vmatprep.subr.mxu1 %v455_v0 }
  0x2f   :  { %325 = vmatpush3.msra.mxu0 %v54_v18  ;;  %360 = vmatpush3.msra.mxu1 %v70_v21 }
  0x30   :  { %326 = vmatprep.subr.mxu0 %v455_v0  ;;  %361 = vmatprep.subr.mxu1 %v455_v0 }
  0x31   :  { %327 = vmatpush3.msra.mxu0 %v53_v20  ;;  %362 = vmatpush3.msra.mxu1 %v69_v23 }
  0x32   :  { %328 = vmatprep.subr.mxu0 %v455_v0  ;;  %363 = vmatprep.subr.mxu1 %v455_v0 }
  0x33   :  { %329 = vmatpush3.msra.mxu0 %v52_v22  ;;  %364 = vmatpush3.msra.mxu1 %v68_v25 }
  0x34   :  { %330 = vmatprep.subr.mxu0 %v455_v0  ;;  %365 = vmatprep.subr.mxu1 %v455_v0 }
  0x35   :  { %331 = vmatpush3.msra.mxu0 %v51_v24  ;;  %366 = vmatpush3.msra.mxu1 %v67_v27 }
  0x36   :  { %332 = vmatprep.subr.mxu0 %v455_v0  ;;  %367 = vmatprep.subr.mxu1 %v455_v0 }
  0x37   :  { %333 = vmatpush3.msra.mxu0 %v50_v26  ;;  %368 = vmatpush3.msra.mxu1 %v66_v29 }
  0x38   :  { %334 = vmatprep.subr.mxu0 %v455_v0  ;;  %369 = vmatprep.subr.mxu1 %v455_v0 }
  0x39   :  { %335 = vmatpush3.msra.mxu0 %v49_v28  ;;  %370 = vmatpush3.msra.mxu1 %v65_v31 }
  0x3a   :  { %336 = vmatprep.subr.mxu0 %v455_v0  ;;  %371 = vmatprep.subr.mxu1 %v455_v0 }
  0x3b   :  { %337 = vmatpush3.msra.mxu0 %v48_v30  ;;  %372 = vmatpush3.msra.mxu1 %v64_v32 }
  0x3c   :  { %339 = vmatmul.mubr.f32.vlgmr.msra.gmra.mxu0 %v47_v33  ;;  %374 = vmatmul.mubr.f32.vlgmr.msra.gmra.mxu1 %v47_v33 }
  0xfc   :  { %v147_v40 = vpop.f32.mrf.mxu0  ;;  %v220_v41 = vpop.f32.mrf.mxu1 }
  0xfd   :  { %v246_v43 = vadd.f32 %v244_v39, %v220_v41  ;;  %v237_v49 = vadd.f32 %v235_v48, %v147_v40 }
  0xfe   :  { %v340_v42 = vpop.f32.mrf.mxu0  ;;  %v375_v44 = vpop.f32.mrf.mxu1 }
  0xff   :  { %vm247_vm1 = vcmp.ge.f32.partialorder %v246_v43, 0.0  ;;  %v248_v45 = vadd.f32 1e-06, %v246_v43  ;;  %v271_v46 = vadd.f32 -1e-06, %v246_v43 }
 0x101   :  { %v250_v47 = vsel %vm247_vm1, %v248_v45, %v271_v46 }
 0x102   :  { %383 = vrcp.f32 %v250_v47 }
 0x10f   :  { %v384_v50 = vpop.eup %383 }
 0x110   :  { %v252_v51 = vmul.f32 %v384_v50, %v237_v49 }
 0x112   :  { %v253_v52 = vmul.f32 %v252_v51, %v250_v47 }
 0x114   :  { %254 = vst [vmem:[#allocation8] sm:$0xff] %v253_v52 }
 0x115   :  { %436 = shalt.err (!%p433_p0)
}
 0x116   :  { %264 = dma.vmem_to_hbm [thread:$0]  %s262_s25, 128, %s527_s3, [#allocation5]  }
 0x117   :  { %449 = dma.done.wait [#allocation5], 128  }
 0x118   :  { %450 = vsyncadd [#allocation5], 4294967168 }
 0x119   :  { %268 = vsyncpa [#allocation4], 1 }
 0x11a   :  { %269 = vsyncpa [#allocation7], 1 }
 0x11b   :  { %270 = vsyncpa [#allocation5], 1 }

</bundles_post_ra>
